<compile_context>
chip_gen: v5e
topology: v5e:2x2
jax: 0.10.0
libtpu: 0.0.40
codegen_flags: <defaults>
</compile_context>

<pallas_src>
import jax
import jax.numpy as jnp
from jax.experimental import pallas as pl
from jax.experimental.pallas import tpu as pltpu

LANES = 128
MAX_BLOCK_ROWS = 512   # (512,128) f32 block = 256 KiB; sized safely for v5e/v6e/v7x VMEM
ROW_ALIGN = 16         # multiple of the sublane tile for f32 (8) and bf16/f16 (16)
ACC_ROWS = 8           # per-core partial sums folded to one (8, 128) f32 tile


def _stable_bce_terms(x, t):
    """Per-element stable BCE loss terms (f32), matching the PyTorch formula."""
    neg_abs = -jnp.abs(x)
    return jnp.maximum(x, 0.0) - x * t + jnp.log(1.0 + jnp.exp(neg_abs))


def _stable_bce_sum_kernel(x_ref, t_ref, o_ref, acc_ref):
    # grid = (num_par, blocks_per_par); axis 0 is "parallel", axis 1 is the
    # sequential reduction axis.
    i = pl.program_id(1)

    @pl.when(i == 0)
    def _init():
        acc_ref[...] = jnp.zeros_like(acc_ref)

    x = x_ref[...].astype(jnp.float32)
    t = t_ref[...].astype(jnp.float32)
    # Pure elementwise accumulation (VPU); no per-iteration cross-lane reduce.
    acc_ref[...] += _stable_bce_terms(x, t)

    @pl.when(i == pl.num_programs(1) - 1)
    def _finalize():
        # Fold the (block_rows, 128) accumulator down to one (8, 128) tile with
        # cheap vector adds; the final scalar reduce happens outside the kernel.
        folded = acc_ref[...].reshape(-1, ACC_ROWS, LANES).sum(axis=0)
        o_ref[...] = folded.reshape(1, ACC_ROWS, LANES)


def stable_bce_loss(inp, target):
    """Pallas-TPU StableBCELoss forward: returns a scalar f32 mean loss."""
    x = jnp.asarray(inp)
    t = jnp.asarray(target)
    # Keep floating dtypes (f32/bf16/f16) in HBM as-is; cast happens in-kernel.
    if not jnp.issubdtype(x.dtype, jnp.floating):
        x = x.astype(jnp.float32)
    if not jnp.issubdtype(t.dtype, jnp.floating):
        t = t.astype(jnp.float32)
    x = x.reshape(-1)
    t = t.reshape(-1)
    assert x.shape == t.shape, "input and target must have the same number of elements"

    n = x.shape[0]
    rows_all = n // LANES  # complete 128-lane rows

    # Block size: 512 rows for large inputs; one big block (16-row aligned) for
    # anything under 1024 rows.
    if rows_all >= 2 * MAX_BLOCK_ROWS:
        block_rows = MAX_BLOCK_ROWS
    else:
        block_rows = (rows_all // ROW_ALIGN) * ROW_ALIGN

    total = jnp.float32(0.0)
    n_kernel = 0

    if block_rows > 0:
        num_blocks = rows_all // block_rows
        rows_kernel = num_blocks * block_rows
        n_kernel = rows_kernel * LANES

        # Split the reduction across both TensorCores of a v7x chip when the
        # block count allows it; a no-op sequential loop on single-TC chips.
        num_par = 2 if (num_blocks >= 2 and num_blocks % 2 == 0) else 1
        blocks_per_par = num_blocks // num_par

        # Zero-copy view of all complete rows when n is a multiple of 128
        # (reshape of a contiguous 1-D array is free). The kernel's grid only
        # touches the first `rows_kernel` rows.
        n_rows_elems = rows_all * LANES
        x_head = x if n_rows_elems == n else x[:n_rows_elems]
        t_head = t if n_rows_elems == n else t[:n_rows_elems]
        x2 = x_head.reshape(rows_all, LANES)
        t2 = t_head.reshape(rows_all, LANES)

        def _in_map(c, i):
            return (c * blocks_per_par + i, 0)

        partials = pl.pallas_call(
            _stable_bce_sum_kernel,
            out_shape=jax.ShapeDtypeStruct((num_par, ACC_ROWS, LANES), jnp.float32),
            grid_spec=pltpu.PrefetchScalarGridSpec(
                num_scalar_prefetch=0,
                grid=(num_par, blocks_per_par),
                in_specs=[
                    pl.BlockSpec((block_rows, LANES), _in_map),
                    pl.BlockSpec((block_rows, LANES), _in_map),
                ],
                out_specs=pl.BlockSpec((1, ACC_ROWS, LANES), lambda c, i: (c, 0, 0)),
                scratch_shapes=[pltpu.VMEM((block_rows, LANES), jnp.float32)],
            ),
            compiler_params=pltpu.CompilerParams(
                dimension_semantics=("parallel", "arbitrary"),
            ),
        )(x2, t2)
        total = total + jnp.sum(partials)

    if n_kernel < n:
        # Less than one block of leftover elements: a few plain-JAX ops.
        x_tail = x[n_kernel:].astype(jnp.float32)
        t_tail = t[n_kernel:].astype(jnp.float32)
        total = total + jnp.sum(_stable_bce_terms(x_tail, t_tail))

    return total / jnp.float32(n)


def stable_bce_loss_ref(inp, target):
    """Pure-JAX reference matching the PyTorch module."""
    x = jnp.asarray(inp, jnp.float32).reshape(-1)
    t = jnp.asarray(target, jnp.float32).reshape(-1)
    neg_abs = -jnp.abs(x)
    loss = jnp.maximum(x, 0.0) - x * t + jnp.log(1.0 + jnp.exp(neg_abs))
    return jnp.mean(loss)


if __name__ == "__main__":
    key = jax.random.PRNGKey(0)
    k1, k2 = jax.random.split(key)

    # Small shapes consistent with a typical logits/target pair: (2, 4, 16, 16)
    x = jax.random.normal(k1, (2, 4, 16, 16), dtype=jnp.float32) * 3.0
    tgt = (jax.random.uniform(k2, (2, 4, 16, 16)) > 0.5).astype(jnp.float32)

    out = stable_bce_loss(x, tgt)
    out = jax.block_until_ready(out)

    ref = stable_bce_loss_ref(x, tgt)
    assert jnp.allclose(out, ref, rtol=1e-5, atol=1e-6), (out, ref)

    print("KERNEL_OK")
</pallas_src>

<mosaic_0001>
module attributes {stable_mosaic.version = 11 : i64} {
  func.func @_stable_bce_sum_kernel(%arg0: i32, %arg1: i32, %arg2: memref<16x128xf32, #tpu.memory_space<vmem>>, %arg3: memref<16x128xf32, #tpu.memory_space<vmem>>, %arg4: memref<1x8x128xf32, #tpu.memory_space<vmem>>, %arg5: memref<16x128xf32, #tpu.memory_space<vmem>>) attributes {dimension_semantics = [#tpu.dimension_semantics<parallel>, #tpu.dimension_semantics<arbitrary>], iteration_bounds = array<i64: 1, 1>, scalar_prefetch = 0 : i64, scratch_operands = 1 : i64, tpu.core_type = #tpu.core_type<tc>, window_params = [{transform_indices = @transform_0, window_bounds = array<i64: 16, 128>}, {transform_indices = @transform_1, window_bounds = array<i64: 16, 128>}, {transform_indices = @transform_2, window_bounds = array<i64: 1, 8, 128>}]} {
    %c0_i32 = arith.constant 0 : i32
    %0 = arith.cmpi eq, %arg1, %c0_i32 : i32
    %1 = arith.extui %0 : i1 to i32
    %c0_i32_0 = arith.constant 0 : i32
    %2 = arith.cmpi ne, %1, %c0_i32_0 : i32
    scf.if %2 {
      %cst_12 = arith.constant 0.000000e+00 : f32
      %23 = vector.broadcast %cst_12 : f32 to vector<16x128xf32>
      %c0_13 = arith.constant 0 : index
      %c0_14 = arith.constant 0 : index
      %24 = vector.load %arg5[%c0_13, %c0_14] : memref<16x128xf32, #tpu.memory_space<vmem>>, vector<16x128xf32>
      tpu.vector_store %arg5[%c0_13, %c0_14], %23 {strides = array<i32>} : memref<16x128xf32, #tpu.memory_space<vmem>>, vector<16x128xf32>,
    } else {
    }
    %c0 = arith.constant 0 : index
    %c0_1 = arith.constant 0 : index
    %3 = vector.load %arg2[%c0, %c0_1] : memref<16x128xf32, #tpu.memory_space<vmem>>, vector<16x128xf32>
    %c0_2 = arith.constant 0 : index
    %c0_3 = arith.constant 0 : index
    %4 = vector.load %arg3[%c0_2, %c0_3] : memref<16x128xf32, #tpu.memory_space<vmem>>, vector<16x128xf32>
    %c0_4 = arith.constant 0 : index
    %c0_5 = arith.constant 0 : index
    %5 = vector.load %arg5[%c0_4, %c0_5] : memref<16x128xf32, #tpu.memory_space<vmem>>, vector<16x128xf32>
    %6 = math.absf %3 : vector<16x128xf32>
    %cst = arith.constant 0.000000e+00 : f32
    %7 = vector.broadcast %cst : f32 to vector<16x128xf32>
    %8 = arith.subf %7, %6 : vector<16x128xf32>
    %cst_6 = arith.constant 0.000000e+00 : f32
    %9 = vector.broadcast %cst_6 : f32 to vector<16x128xf32>
    %10 = arith.maximumf %3, %9 : vector<16x128xf32>
    %11 = arith.mulf %3, %4 : vector<16x128xf32>
    %12 = arith.subf %10, %11 : vector<16x128xf32>
    %13 = math.exp %8 : vector<16x128xf32>
    %cst_7 = arith.constant 1.000000e+00 : f32
    %14 = vector.broadcast %cst_7 : f32 to vector<16x128xf32>
    %15 = arith.addf %14, %13 : vector<16x128xf32>
    %16 = math.log %15 : vector<16x128xf32>
    %17 = arith.addf %12, %16 : vector<16x128xf32>
    %18 = arith.addf %5, %17 : vector<16x128xf32>
    %c0_8 = arith.constant 0 : index
    %c0_9 = arith.constant 0 : index
    %19 = vector.load %arg5[%c0_8, %c0_9] : memref<16x128xf32, #tpu.memory_space<vmem>>, vector<16x128xf32>
    tpu.vector_store %arg5[%c0_8, %c0_9], %18 {strides = array<i32>} : memref<16x128xf32, #tpu.memory_space<vmem>>, vector<16x128xf32>,
    %c0_i32_10 = arith.constant 0 : i32
    %20 = arith.cmpi eq, %arg1, %c0_i32_10 : i32
    %21 = arith.extui %20 : i1 to i32
    %c0_i32_11 = arith.constant 0 : i32
    %22 = arith.cmpi ne, %21, %c0_i32_11 : i32
    scf.if %22 {
      %c0_12 = arith.constant 0 : index
      %c0_13 = arith.constant 0 : index
      %23 = vector.load %arg5[%c0_12, %c0_13] : memref<16x128xf32, #tpu.memory_space<vmem>>, vector<16x128xf32>
      %24 = vector.shape_cast %23 : vector<16x128xf32> to vector<2x8x128xf32>
      %cst_14 = arith.constant dense<0.000000e+00> : vector<8x128xf32>
      %25 = vector.multi_reduction <add>, %24, %cst_14 [0] : vector<2x8x128xf32> to vector<8x128xf32>
      %26 = vector.shape_cast %25 : vector<8x128xf32> to vector<1x8x128xf32>
      %c0_15 = arith.constant 0 : index
      %c0_16 = arith.constant 0 : index
      %c0_17 = arith.constant 0 : index
      %27 = vector.load %arg4[%c0_15, %c0_16, %c0_17] : memref<1x8x128xf32, #tpu.memory_space<vmem>>, vector<1x8x128xf32>
      tpu.vector_store %arg4[%c0_15, %c0_16, %c0_17], %26 {strides = array<i32>} : memref<1x8x128xf32, #tpu.memory_space<vmem>>, vector<1x8x128xf32>,
    } else {
    }
    return
  }
  func.func @transform_0(%arg0: i32, %arg1: i32) -> (i32, i32) {
    %c1_i32 = arith.constant 1 : i32
    %0 = arith.muli %arg0, %c1_i32 : i32
    %1 = arith.addi %0, %arg1 : i32
    %c0_i32 = arith.constant 0 : i32
    %c0_i32_0 = arith.constant 0 : i32
    return %1, %c0_i32 : i32, i32
  }
  func.func @transform_1(%arg0: i32, %arg1: i32) -> (i32, i32) {
    %c1_i32 = arith.constant 1 : i32
    %0 = arith.muli %arg0, %c1_i32 : i32
    %1 = arith.addi %0, %arg1 : i32
    %c0_i32 = arith.constant 0 : i32
    %c0_i32_0 = arith.constant 0 : i32
    return %1, %c0_i32 : i32, i32
  }
  func.func @transform_2(%arg0: i32, %arg1: i32) -> (i32, i32, i32) {
    %c0_i32 = arith.constant 0 : i32
    %c0_i32_0 = arith.constant 0 : i32
    %c0_i32_1 = arith.constant 0 : i32
    return %arg0, %c0_i32, %c0_i32_0 : i32, i32, i32
  }
}

</mosaic_0001>

<bundles_post_ra>
// kernel: tpu_custom_call.1
= control target key start
LH: loop header
LB: loop body
LE: loop exit
PB: predicated region body
PF: predicated region fallthrough
CT: control target
= control target key end

     0   :  { %7 = vsyncpa [#allocation4], 0  ;;  %s239_s0 = inlined_call_operand.hbm [shape: f32[16,128], index: 0, kind: input, shape index: {}]   ;;  %s240_s1 = inlined_call_operand.hbm [shape: f32[16,128], index: 1, kind: input, shape index: {}]   ;;  %s241_s2 = inlined_call_operand.hbm [shape: f32[1,8,128], index: 2, kind: output, shape index: {}]  }
   0x1   :  { %8 = vsyncpa [#allocation7], 0 }
   0x2   :  { %9 = vsyncpa [#allocation5], 0  ;;  %s18_s11 = sshll.u32 %s239_s0, 4  ;;  %s210_s12 = smov [#allocation3]   ;;  %s19_s11 = int_to_ptr.hbm [resolvable:$true] %s18_s11 }
   0x3   :  { %s20_s13 = sshll.u32 %s210_s12, 4  ;;  %s35_s16 = sshll.u32 %s240_s1, 4  ;;  %s21_s13 = int_to_ptr.vmem [resolvable:$true] %s20_s13  ;;  %s36_s16 = int_to_ptr.hbm [resolvable:$true] %s35_s16 }
   0x4   :  { %s211_s17 = smov 128   ;;  %s212_s18 = smov 8  }
   0x5   :  { %26 = dma.hbm_to_vmem [thread:$0]  %s19_s11, 256, %s21_s13, [#allocation4], %s211_s17, %s211_s17, %s212_s18  }
   0x6   :  { %s213_s19 = smov [#allocation6]  }
   0x7   :  { %s37_s20 = sshll.u32 %s213_s19, 4  ;;  %s38_s20 = int_to_ptr.vmem [resolvable:$true] %s37_s20 }
   0x8   :  { %43 = dma.hbm_to_vmem [thread:$0]  %s36_s16, 256, %s38_s20, [#allocation7], %s211_s17, %s211_s17, %s212_s18  }
   0x9   :  { %204 = dma.done.wait [#allocation4], 256  }
   0xa   :  { %205 = vsyncadd [#allocation4], 4294967040 }
   0xb   :  { %206 = dma.done.wait [#allocation7], 256  }
   0xc   :  { %207 = vsyncadd [#allocation7], 4294967040  ;;  %v62_v0 = vld [vmem:[#allocation3] sm:$0xff]  ;;  %v63_v1 = vld [vmem:[#allocation3 + $0x8] sm:$0xff]  ;;  %s214_s0 = smov [#allocation8]   ;;  %s108_s23 = sshll.u32 %s241_s2, 4  ;;  %s109_s23 = int_to_ptr.hbm [resolvable:$true] %s108_s23 }
   0xd   :  { %v68_v2 = vand.u32 2147483647, %v62_v0  ;;  %v69_v3 = vand.u32 2147483647, %v63_v1  ;;  %v64_v10 = vld [vmem:[#allocation6] sm:$0xff]  ;;  %v65_v12 = vld [vmem:[#allocation6 + $0x8] sm:$0xff] }
   0xe   :  { %v72_v14 = vmax.f32 %v62_v0, 0.0  ;;  %v74_v15 = vmul.f32 %v64_v10, %v62_v0  ;;  %v73_v16 = vmax.f32 %v63_v1, 0.0  ;;  %v75_v17 = vmul.f32 %v65_v12, %v63_v1  ;;  %s106_s1 = sshll.u32 %s214_s0, 4  ;;  %s107_s1 = int_to_ptr.vmem [resolvable:$true] %s106_s1 }
   0xf   :  { %v70_v4 = vsub.f32 0.0, %v68_v2  ;;  %v71_v5 = vsub.f32 0.0, %v69_v3 }
  0x10   :  { %v76_v18 = vsub.f32 %v72_v14, %v74_v15  ;;  %v77_v20 = vsub.f32 %v73_v16, %v75_v17 }
  0x11   :  { %v78_v6 = vmul.f32 1.442695, %v70_v4  ;;  %v80_v7 = vmul.f32 1.442695, %v71_v5 }
  0x13   :  { %124 = vpow2.f32 %v78_v6 }
  0x14   :  { %126 = vpow2.f32 %v80_v7 }
  0x19   :  { %v125_v8 = vpop.eup %124 }
  0x1a   :  { %v127_v9 = vpop.eup %126  ;;  %v82_v11 = vadd.f32 1.0, %v125_v8 }
  0x1b   :  { %v83_v13 = vadd.f32 1.0, %v127_v9 }
  0x1c   :  { %128 = vlog2.f32 %v82_v11 }
  0x1d   :  { %130 = vlog2.f32 %v83_v13 }
  0x22   :  { %v129_v19 = vpop.eup %128 }
  0x23   :  { %v131_v21 = vpop.eup %130  ;;  %v85_v22 = vmul.f32 0.6931472, %v129_v19 }
  0x24   :  { %v87_v23 = vmul.f32 0.6931472, %v131_v21 }
  0x25   :  { %v88_v24 = vadd.f32 %v85_v22, %v76_v18 }
  0x26   :  { %v89_v25 = vadd.f32 %v87_v23, %v77_v20 }
  0x28   :  { %v99_v26 = vadd.f32 %v89_v25, %v88_v24 }
  0x2a   :  { %100 = vst [vmem:[#allocation8] sm:$0xff] %v99_v26 }
  0x2b   :  { %111 = dma.vmem_to_hbm [thread:$0]  %s107_s1, 128, %s109_s23, [#allocation5]  }
  0x2c   :  { %208 = dma.done.wait [#allocation5], 128  }
  0x2d   :  { %209 = vsyncadd [#allocation5], 4294967168 }
  0x2e   :  { %116 = vsyncpa [#allocation4], 1 }
  0x2f   :  { %117 = vsyncpa [#allocation7], 1 }
  0x30   :  { %118 = vsyncpa [#allocation5], 1 }

</bundles_post_ra>
